<compile_context>
chip_gen: v5e
topology: v5e:2x2
jax: 0.10.0
libtpu: 0.0.40
codegen_flags: <defaults>
</compile_context>

<pallas_src>
import functools

import jax
import jax.numpy as jnp
from jax.experimental import pallas as pl
from jax.experimental.pallas import tpu as pltpu


def _round_up(x, m):
    return (x + m - 1) // m * m


@functools.lru_cache(maxsize=None)
def _vmem_capacity_bytes():
    """Physical VMEM per TensorCore; conservative 64 MiB (v7x) fallback."""
    try:
        info = pltpu.get_tpu_info()
        cap = getattr(info, "vmem_capacity_bytes", None)
        if cap:
            return int(cap)
    except Exception:
        pass
    return 64 * 1024 * 1024


def _patch_embed_kernel(x_ref, w_ref, b_ref, o_ref):
    # x_ref: (TM, K) bf16 patch rows (streamed)
    # w_ref: (K, Npad) bf16 weight   (VMEM-resident, constant index_map)
    # b_ref: (1, Npad) f32 bias      (VMEM-resident)
    # o_ref: (TM, Npad) out_dtype output tile
    acc = jnp.dot(x_ref[...], w_ref[...], preferred_element_type=jnp.float32)
    o_ref[...] = (acc + b_ref[...]).astype(o_ref.dtype)


def prepare_proj_params(weight, bias, *, compute_dtype=jnp.bfloat16, n_align=128):
    """Hoisted parameter prep (do once, not per forward call).

    Conv3d weight (O, C, kt, kh, kw) -> (K, Npad) matmul matrix, bias -> (1, Npad),
    N zero-padded to a lane-dense multiple of `n_align` (128 default; 256 can be
    used on v6e/v7x to fill the 256x256 MXU when embed_dim is an odd size).
    Contraction order (c, kt, kh, kw) matches the patch flattening below.
    """
    embed_dim = weight.shape[0]
    K = weight.size // embed_dim
    n_pad = _round_up(embed_dim, n_align)
    w_mat = weight.reshape(embed_dim, K).T.astype(compute_dtype)          # (K, N)
    w_mat = jnp.pad(w_mat, ((0, 0), (0, n_pad - embed_dim)))              # (K, Npad)
    b_row = jnp.pad(
        bias.astype(jnp.float32).reshape(1, embed_dim),
        ((0, 0), (0, n_pad - embed_dim)),
    )                                                                     # (1, Npad)
    return w_mat, b_row


@functools.partial(
    jax.jit,
    static_argnames=(
        "patch_size", "t_patch_size", "embed_dim", "block_m",
        "compute_dtype", "out_dtype", "use_input_fusion",
    ),
)
def _patch_embed_impl(
    x, w_mat, b_row, *, patch_size, t_patch_size, embed_dim,
    block_m, compute_dtype, out_dtype, use_input_fusion,
):
    B, C, T, H, W = x.shape
    p, tp = patch_size, t_patch_size
    assert H % p == 0 and W % p == 0 and T % tp == 0
    Tg, Hg, Wg = T // tp, H // p, W // p
    K = C * tp * p * p
    M = B * Tg * Hg * Wg
    n_pad = w_mat.shape[1]
    assert w_mat.shape[0] == K and n_pad % 128 == 0

    # --- patch extraction (pure data movement) -------------------------------
    # bf16 cast is folded into the same producer as the transpose; with
    # allow_input_fusion enabled this whole block is fused into the
    # pallas_call's input DMA, so `patches` is never materialized in HBM.
    # For bit-closer parity with the f32 PyTorch Conv3d, pass
    # compute_dtype=out_dtype=jnp.float32 (and prepare params in f32).
    xp = x.astype(compute_dtype).reshape(B, C, Tg, tp, Hg, p, Wg, p)
    xp = jnp.transpose(xp, (0, 2, 4, 6, 1, 3, 5, 7))   # (B, Tg, Hg, Wg, C, tp, p, p)
    patches = xp.reshape(M, K)

    # --- per-generation tile / VMEM budget -----------------------------------
    in_b = jnp.dtype(compute_dtype).itemsize
    out_b = jnp.dtype(out_dtype).itemsize
    vmem_cap = _vmem_capacity_bytes()
    resident = K * n_pad * in_b + n_pad * 4            # weight + bias, VMEM-resident

    def budget(t):
        # double-buffered patch tile + double-buffered output tile + residents
        return 2 * t * K * in_b + 2 * t * n_pad * out_b + resident

    if M <= 8:
        tm = M                                          # full-dim block (allowed)
    else:
        tm = min(block_m, _round_up(M, 8))
        # Ensure >= 2 grid steps so the "parallel" M axis shards across both
        # v7x TensorCores (harmless extra step on single-core v5e/v6e).
        tm = min(tm, _round_up(pl.cdiv(M, 2), 8))
        # Shrink the tile until the pipelined budget fits ~45% of this part's
        # VMEM (keeps 2048-row tiles on 128 MiB v5e/v6e, halves on 64 MiB v7x).
        while tm >= 16 and budget(tm) > 0.45 * vmem_cap:
            tm = max(8, _round_up(tm // 2, 8))
    grid_m = pl.cdiv(M, tm)

    vmem_limit = int(min(max(16 * 1024 * 1024, (budget(tm) * 3) // 2),
                         (vmem_cap * 9) // 10))

    cost = pl.CostEstimate(
        flops=2 * M * K * n_pad,
        transcendentals=0,
        bytes_accessed=M * K * in_b + K * n_pad * in_b + M * n_pad * out_b,
    )

    # TODO(synk): single-buffer the resident weight/bias blocks
    # (pipeline_mode=pl.Buffered(1)) to reclaim K*n_pad*in_b bytes on v7x once
    # that is reliably supported by the top-level pallas_call pipeline.
    out = pl.pallas_call(
        _patch_embed_kernel,
        out_shape=jax.ShapeDtypeStruct((M, n_pad), out_dtype),
        grid_spec=pltpu.PrefetchScalarGridSpec(
            num_scalar_prefetch=0,
            grid=(grid_m,),
            in_specs=[
                pl.BlockSpec((tm, K), lambda i: (i, 0)),       # streamed patch rows
                pl.BlockSpec((K, n_pad), lambda i: (0, 0)),    # VMEM-resident weight
                pl.BlockSpec((1, n_pad), lambda i: (0, 0)),    # VMEM-resident bias
            ],
            out_specs=pl.BlockSpec((tm, n_pad), lambda i: (i, 0)),
        ),
        compiler_params=pltpu.CompilerParams(
            dimension_semantics=("parallel",),
            vmem_limit_bytes=vmem_limit,
            allow_input_fusion=([True, False, False] if use_input_fusion else None),
        ),
        cost_estimate=cost,
    )(patches, w_mat, b_row)

    # Drop N padding only when it exists (no extra output pass when embed_dim
    # is already lane-aligned); the reshape below is a free row-major split.
    if n_pad != embed_dim:
        out = out[:, :embed_dim]
    # (M, embed_dim) -> (B, Tg, Hg*Wg, embed_dim) == torch.einsum('ncts->ntsc')
    return out.reshape(B, Tg, Hg * Wg, embed_dim)


_INPUT_FUSION_OK = None  # one-time probe result for allow_input_fusion


def patch_embed_forward(
    x, w_mat, b_row, *, patch_size, t_patch_size, embed_dim,
    block_m=2048, compute_dtype=jnp.bfloat16, out_dtype=jnp.bfloat16,
):
    """PatchEmbed forward.  x: (B, C, T, H, W); returns (B, T//tp, (H//p)*(W//p), embed_dim)."""
    global _INPUT_FUSION_OK
    kw = dict(
        patch_size=patch_size, t_patch_size=t_patch_size, embed_dim=embed_dim,
        block_m=block_m, compute_dtype=compute_dtype, out_dtype=out_dtype,
    )
    if _INPUT_FUSION_OK is None:
        try:
            out = _patch_embed_impl(x, w_mat, b_row, use_input_fusion=True, **kw)
            jax.block_until_ready(out)
            _INPUT_FUSION_OK = True
            return out
        except Exception:
            # This jax/libtpu build rejected input fusion of the patch
            # transpose; fall back to the (still correct) materialized path.
            _INPUT_FUSION_OK = False
    return _patch_embed_impl(x, w_mat, b_row, use_input_fusion=_INPUT_FUSION_OK, **kw)


if __name__ == "__main__":
    # Small shapes consistent with the module's constraints:
    #   img_size=16, patch_size=8, in_chans=3, embed_dim=32, frames=8, t_patch_size=4
    B, C, T, H, W = 2, 3, 8, 16, 16
    patch_size, t_patch_size, embed_dim = 8, 4, 32

    key = jax.random.PRNGKey(0)
    kx, kw_, kb = jax.random.split(key, 3)

    x = jax.random.normal(kx, (B, C, T, H, W), dtype=jnp.float32)
    # Deterministic synthetic init for the Conv3d params (shapes from nn.Conv3d).
    weight = 0.02 * jax.random.normal(
        kw_, (embed_dim, C, t_patch_size, patch_size, patch_size), dtype=jnp.float32
    )
    bias = 0.01 * jax.random.normal(kb, (embed_dim,), dtype=jnp.float32)

    w_mat, b_row = prepare_proj_params(weight, bias)
    out = patch_embed_forward(
        x, w_mat, b_row,
        patch_size=patch_size, t_patch_size=t_patch_size, embed_dim=embed_dim,
    )
    jax.block_until_ready(out)

    # Reference semantics of the PyTorch module via XLA conv (f32).
    ref = jax.lax.conv_general_dilated(
        x, weight,
        window_strides=(t_patch_size, patch_size, patch_size),
        padding="VALID",
        dimension_numbers=("NCTHW", "OITHW", "NCTHW"),
    ) + bias.reshape(1, embed_dim, 1, 1, 1)
    ref = ref.reshape(B, embed_dim, T // t_patch_size, -1)
    ref = jnp.einsum("ncts->ntsc", ref)

    assert out.shape == (B, T // t_patch_size, (H // patch_size) * (W // patch_size), embed_dim)
    # bf16 inputs + bf16 output with f32 MXU accumulation -> loose tolerance.
    out_f32 = out.astype(jnp.float32)
    max_err = float(jnp.max(jnp.abs(out_f32 - ref)))
    assert jnp.allclose(out_f32, ref, atol=5e-2, rtol=5e-2), f"max_err={max_err}"

    print("KERNEL_OK")
</pallas_src>

<mosaic_0001>
module attributes {stable_mosaic.version = 11 : i64} {
  func.func @_patch_embed_kernel(%arg0: i32, %arg1: memref<8x768xbf16, #tpu.memory_space<vmem>>, %arg2: memref<768x128xbf16, #tpu.memory_space<vmem>>, %arg3: memref<1x128xf32, #tpu.memory_space<vmem>>, %arg4: memref<8x128xbf16, #tpu.memory_space<vmem>>) attributes {dimension_semantics = [#tpu.dimension_semantics<parallel>], iteration_bounds = array<i64: 2>, scalar_prefetch = 0 : i64, scratch_operands = 0 : i64, tpu.core_type = #tpu.core_type<tc>, window_params = [{transform_indices = @transform_0, window_bounds = array<i64: 8, 768>}, {pipeline_mode = #tpu.pipeline_mode<synchronous>, transform_indices = @transform_1, window_bounds = array<i64: 768, 128>}, {pipeline_mode = #tpu.pipeline_mode<synchronous>, transform_indices = @transform_2, window_bounds = array<i64: 1, 128>}, {transform_indices = @transform_3, window_bounds = array<i64: 8, 128>}]} {
    %c0 = arith.constant 0 : index
    %c0_0 = arith.constant 0 : index
    %0 = vector.load %arg1[%c0, %c0_0] : memref<8x768xbf16, #tpu.memory_space<vmem>>, vector<8x768xbf16>
    %c0_1 = arith.constant 0 : index
    %c0_2 = arith.constant 0 : index
    %1 = vector.load %arg2[%c0_1, %c0_2] : memref<768x128xbf16, #tpu.memory_space<vmem>>, vector<768x128xbf16>
    %cst = arith.constant dense<0.000000e+00> : vector<8x128xf32>
    %2 = tpu.matmul %0, %1, %cst {dimension_numbers = #tpu.dot_dimension_numbers<[1], [0], [0], [1], [0, 0, 1, 1], [], []>} : vector<8x768xbf16>, vector<768x128xbf16>, vector<8x128xf32> -> vector<8x128xf32>
    %c0_3 = arith.constant 0 : index
    %c0_4 = arith.constant 0 : index
    %3 = vector.load %arg3[%c0_3, %c0_4] : memref<1x128xf32, #tpu.memory_space<vmem>>, vector<1x128xf32>
    %4 = vector.broadcast %3 : vector<1x128xf32> to vector<8x128xf32>
    %5 = arith.addf %2, %4 : vector<8x128xf32>
    %6 = arith.truncf %5 : vector<8x128xf32> to vector<8x128xbf16>
    %c0_5 = arith.constant 0 : index
    %c0_6 = arith.constant 0 : index
    %7 = vector.load %arg4[%c0_5, %c0_6] : memref<8x128xbf16, #tpu.memory_space<vmem>>, vector<8x128xbf16>
    tpu.vector_store %arg4[%c0_5, %c0_6], %6 {strides = array<i32>} : memref<8x128xbf16, #tpu.memory_space<vmem>>, vector<8x128xbf16>,
    return
  }
  func.func @transform_0(%arg0: i32) -> (i32, i32) {
    %c0_i32 = arith.constant 0 : i32
    %c0_i32_0 = arith.constant 0 : i32
    return %arg0, %c0_i32 : i32, i32
  }
  func.func @transform_1(%arg0: i32) -> (i32, i32) {
    %c0_i32 = arith.constant 0 : i32
    %c0_i32_0 = arith.constant 0 : i32
    %c0_i32_1 = arith.constant 0 : i32
    return %c0_i32, %c0_i32_0 : i32, i32
  }
  func.func @transform_2(%arg0: i32) -> (i32, i32) {
    %c0_i32 = arith.constant 0 : i32
    %c0_i32_0 = arith.constant 0 : i32
    %c0_i32_1 = arith.constant 0 : i32
    return %c0_i32, %c0_i32_0 : i32, i32
  }
  func.func @transform_3(%arg0: i32) -> (i32, i32) {
    %c0_i32 = arith.constant 0 : i32
    %c0_i32_0 = arith.constant 0 : i32
    return %arg0, %c0_i32 : i32, i32
  }
}

module attributes {stable_mosaic.version = 11 : i64} {
  func.func @_patch_embed_kernel(%arg0: i32, %arg1: memref<8x768xbf16, #tpu.memory_space<vmem>>, %arg2: memref<768x128xbf16, #tpu.memory_space<vmem>>, %arg3: memref<1x128xf32, #tpu.memory_space<vmem>>, %arg4: memref<8x128xbf16, #tpu.memory_space<vmem>>) attributes {dimension_semantics = [#tpu.dimension_semantics<parallel>], iteration_bounds = array<i64: 2>, scalar_prefetch = 0 : i64, scratch_operands = 0 : i64, tpu.core_type = #tpu.core_type<tc>, window_params = [{transform_indices = @transform_0, window_bounds = array<i64: 8, 768>}, {pipeline_mode = #tpu.pipeline_mode<synchronous>, transform_indices = @transform_1, window_bounds = array<i64: 768, 128>}, {pipeline_mode = #tpu.pipeline_mode<synchronous>, transform_indices = @transform_2, window_bounds = array<i64: 1, 128>}, {transform_indices = @transform_3, window_bounds = array<i64: 8, 128>}]} {
    %c0 = arith.constant 0 : index
    %c0_0 = arith.constant 0 : index
    %0 = vector.load %arg1[%c0, %c0_0] : memref<8x768xbf16, #tpu.memory_space<vmem>>, vector<8x768xbf16>
    %c0_1 = arith.constant 0 : index
    %c0_2 = arith.constant 0 : index
    %1 = vector.load %arg2[%c0_1, %c0_2] : memref<768x128xbf16, #tpu.memory_space<vmem>>, vector<768x128xbf16>
    %cst = arith.constant dense<0.000000e+00> : vector<8x128xf32>
    %2 = tpu.matmul %0, %1, %cst {dimension_numbers = #tpu.dot_dimension_numbers<[1], [0], [0], [1], [0, 0, 1, 1], [], []>} : vector<8x768xbf16>, vector<768x128xbf16>, vector<8x128xf32> -> vector<8x128xf32>
    %c0_3 = arith.constant 0 : index
    %c0_4 = arith.constant 0 : index
    %3 = vector.load %arg3[%c0_3, %c0_4] : memref<1x128xf32, #tpu.memory_space<vmem>>, vector<1x128xf32>
    %4 = vector.broadcast %3 : vector<1x128xf32> to vector<8x128xf32>
    %5 = arith.addf %2, %4 : vector<8x128xf32>
    %6 = arith.truncf %5 : vector<8x128xf32> to vector<8x128xbf16>
    %c0_5 = arith.constant 0 : index
    %c0_6 = arith.constant 0 : index
    %7 = vector.load %arg4[%c0_5, %c0_6] : memref<8x128xbf16, #tpu.memory_space<vmem>>, vector<8x128xbf16>
    tpu.vector_store %arg4[%c0_5, %c0_6], %6 {strides = array<i32>} : memref<8x128xbf16, #tpu.memory_space<vmem>>, vector<8x128xbf16>,
    return
  }
  func.func @transform_0(%arg0: i32) -> (i32, i32) {
    %c0_i32 = arith.constant 0 : i32
    %c0_i32_0 = arith.constant 0 : i32
    return %arg0, %c0_i32 : i32, i32
  }
  func.func @transform_1(%arg0: i32) -> (i32, i32) {
    %c0_i32 = arith.constant 0 : i32
    %c0_i32_0 = arith.constant 0 : i32
    %c0_i32_1 = arith.constant 0 : i32
    return %c0_i32, %c0_i32_0 : i32, i32
  }
  func.func @transform_2(%arg0: i32) -> (i32, i32) {
    %c0_i32 = arith.constant 0 : i32
    %c0_i32_0 = arith.constant 0 : i32
    %c0_i32_1 = arith.constant 0 : i32
    return %c0_i32, %c0_i32_0 : i32, i32
  }
  func.func @transform_3(%arg0: i32) -> (i32, i32) {
    %c0_i32 = arith.constant 0 : i32
    %c0_i32_0 = arith.constant 0 : i32
    return %arg0, %c0_i32 : i32, i32
  }
}

</mosaic_0001>

<bundles_post_ra>
// kernel: _patch_embed_impl.1
= control target key start
LH: loop header
LB: loop body
LE: loop exit
PB: predicated region body
PF: predicated region fallthrough
CT: control target
= control target key end

     0   :  { %8 = vsyncpa [#allocation3], 0  ;;  %s1348_s0 = inlined_call_operand.vmem [shape: bf16[16,768], index: 0, kind: input, shape index: {}]   ;;  %s1349_s1 = inlined_call_operand.vmem [shape: bf16[768,128], index: 1, kind: input, shape index: {}]   ;;  %s1350_s2 = inlined_call_operand.vmem [shape: f32[1,128], index: 2, kind: input, shape index: {}]   ;;  %s1351_s3 = inlined_call_operand.hbm [shape: bf16[16,128], index: 3, kind: output, shape index: {}]  }
   0x1   :  { %10 = vsyncpa [#allocation3 + $0x1], 0  ;;  %s1111_s12 = smov 0   ;;  %s1113_s13 = smov 0  }
   0x2   :  { %s1115_s14 = smov 0   ;;  %s1117_s15 = smov 0  }
   0x3 LB: > { %s1132_s16 = sadd.s32 4294967295, %s1089_s15   ;;  %s736_s17 = sadd.s32 4294967294, %s1089_s15   ;;  %s1089_s15 = sphi %s1117_s15, %s1357_s15   ;;  %s1085_s14 = sphi %s1115_s14, %s1356_s14   ;;  %s1081_s13 = sphi %s1113_s13, %s1355_s13   ;;  %s1077_s12 = sphi %s1111_s12, %s1354_s12  }
   0x4   : > { %s1136_s18 = sadd.s32 1, %s1089_s15   ;;  %s91_s19 = sadd.s32 1, %s1085_s14 }
   0x5   : > { %s88_s20 = ssub.s32 %s1089_s15, %s1136_s18  ;;  %p101_p0 = scmp.ne.s32.totalorder %s1085_s14, %s1081_s13 }
   0x6   : > { %p89_p1 = scmp.eq.s32.totalorder %s88_s20, 0  ;;  %p102_p2 = scmp.eq.s32.totalorder %s1132_s16, 1 }
   0x7   : > { %p107_p3 = scmp.ne.s32.totalorder %s1081_s13, %s1077_s12  ;;  %p108_p4 = scmp.eq.s32.totalorder %s736_s17, 1 }
   0x8   : > { %s1147_s21 = scalar_select %p89_p1, %s1085_s14, %s91_s19  }
   0x9   : > { %p1149_p5 = por %p102_p2, %p101_p0  ;;  %p1153_p6 = por %p108_p4, %p107_p3 }
   0xa   : > { %p739_p7 = scmp.ge.s32.totalorder %s1089_s15, 1  ;;  %p140_p8 = scmp.lt.s32.totalorder %s1089_s15, 3 }
   0xc   : > { %p141_p9 = pnand %p739_p7, %p140_p8 }
   0xd   : > { %p164_p10 = scmp.lt.s32.totalorder (!%p141_p9), %s1132_s16, 1  ;;  %s161_s17 = sand.u32 (!%p141_p9), 1, %s1081_s13  }
   0xe   : > { %144 = sbr.rel (%p141_p9) target bundleno = 220 (0xdc), region = 32  ;;  %s740_s19 = sshll.u32 (!%p141_p9), %s161_s17, 2 }
   0xf   : > { %s935_s20 = sshll.u32 (!%p141_p9), %s1132_s16, 2  ;;  %s163_s27 = scalar_lea.vmem (!%p141_p9), [#allocation2], %s740_s19 }
  0x10   : > { %s672_s26 = scalar_lea.hbm (!%p141_p9), %s1351_s3, %s935_s20  ;;  %s674_s28 = sshll.u32 (!%p141_p9), %s163_s27, 4  ;;  %s675_s28 = int_to_ptr.vmem [resolvable:$true] %s674_s28 }
  0x11   : > { %s676_s29 = sshll.u32 (!%p141_p9), %s672_s26, 4  ;;  %s677_s29 = int_to_ptr.hbm [resolvable:$true] %s676_s29 }
  0x12   : > { %s1041_s30 = sshra.s32 (!%p141_p9), %s677_s29, 4  ;;  %s1042_s30 = int_to_ptr.hbm [resolvable:$true] %s1041_s30 }
  0x13   : > { %v945_v0 = vld [vmem:[%s1349_s1 + $0x38] sm:$0xff]  ;;  %v944_v2 = vld [vmem:[%s1349_s1 + $0x30] sm:$0xff]  ;;  %v943_v8 = vld [vmem:[%s1349_s1 + $0x28] sm:$0xff]  ;;  %s165_s7 = scalar_select %p164_p10, %s1132_s16, 1 }
  0x14   : > { %v953_v1 = vld [vmem:[%s1349_s1 + $0x78] sm:$0xff]  ;;  %581 = vmatpush.bf16.msra.mxu0 %v945_v0  ;;  %v952_v3 = vld [vmem:[%s1349_s1 + $0x70] sm:$0xff]  ;;  %v951_v9 = vld [vmem:[%s1349_s1 + $0x68] sm:$0xff]  ;;  %s662_s16 = scalar_lea.sflag [#allocation3], %s161_s17  ;;  %s1043_s4 = scalar_lea.hbm %s1042_s30, 4 }
  0x15   : > { %594 = vmatpush.bf16.msra.mxu1 %v953_v1  ;;  %v961_v4 = vld [vmem:[%s1349_s1 + $0xb8] sm:$0xff]  ;;  %v960_v6 = vld [vmem:[%s1349_s1 + $0xb0] sm:$0xff]  ;;  %v959_v10 = vld [vmem:[%s1349_s1 + $0xa8] sm:$0xff]  ;;  %s986_s25 = smul.u32 24, %s165_s7  ;;  %p1044_p11 = scmp.ne.s32.totalorder %s1042_s30, %s1043_s4 }
  0x16   : > { %v969_v5 = vld [vmem:[%s1349_s1 + $0xf8] sm:$0xff]  ;;  %607 = vmatpush.bf16.msra.mxu2 %v961_v4  ;;  %v968_v7 = vld [vmem:[%s1349_s1 + $0xf0] sm:$0xff]  ;;  %v967_v11 = vld [vmem:[%s1349_s1 + $0xe8] sm:$0xff]  ;;  %s1047_s7 = scalar_lea.hbm %s1351_s3, 8  ;;  %p1048_p0 = scmp.lt.s32.totalorder %s1042_s30, %s1351_s3 }
  0x17   : > { %620 = vmatpush.bf16.msra.mxu3 %v969_v5  ;;  %v942_v12 = vld [vmem:[%s1349_s1 + $0x20] sm:$0xff]  ;;  %v941_v16 = vld [vmem:[%s1349_s1 + $0x18] sm:$0xff]  ;;  %v940_v20 = vld [vmem:[%s1349_s1 + $0x10] sm:$0xff]  ;;  %s1230_s9 = scalar_lea.vmem %s1348_s0, %s986_s25  ;;  %p1045_p12 = pnand %p1044_p11, %p1149_p5 }
  0x18   : > { %582 = vmatpush.bf16.msra.mxu0 %v944_v2  ;;  %v950_v13 = vld [vmem:[%s1349_s1 + $0x60] sm:$0xff]  ;;  %v949_v17 = vld [vmem:[%s1349_s1 + $0x58] sm:$0xff]  ;;  %v948_v21 = vld [vmem:[%s1349_s1 + $0x50] sm:$0xff]  ;;  %p1049_p1 = scmp.lt.s32.totalorder %s1047_s7, %s1043_s4 }
  0x19   : > { %595 = vmatpush.bf16.msra.mxu1 %v952_v3  ;;  %v958_v14 = vld [vmem:[%s1349_s1 + $0xa0] sm:$0xff]  ;;  %v957_v18 = vld [vmem:[%s1349_s1 + $0x98] sm:$0xff]  ;;  %v956_v22 = vld [vmem:[%s1349_s1 + $0x90] sm:$0xff]  ;;  %p1046_p13 = pneg %p1045_p12 }
  0x1a   : > { %608 = vmatpush.bf16.msra.mxu2 %v960_v6  ;;  %v966_v15 = vld [vmem:[%s1349_s1 + $0xe0] sm:$0xff]  ;;  %v965_v19 = vld [vmem:[%s1349_s1 + $0xd8] sm:$0xff]  ;;  %v964_v23 = vld [vmem:[%s1349_s1 + $0xd0] sm:$0xff]  ;;  %p1050_p2 = por %p1049_p1, %p1048_p0 }
  0x1b   : > { %621 = vmatpush.bf16.msra.mxu3 %v968_v7  ;;  %v939_v24 = vld [vmem:[%s1349_s1 + $0x8] sm:$0xff]  ;;  %v169_v26 = vld [vmem:[%s1230_s9] sm:$0xff]  ;;  %v977_v34 = vld [vmem:[%s1349_s1 + $0x138] sm:$0xff] }
  0x1c   : > { %583 = vmatpush.bf16.msra.mxu0 %v943_v8  ;;  %v947_v25 = vld [vmem:[%s1349_s1 + $0x48] sm:$0xff]  ;;  %v275_v29 = vunpack.c.l.b16 %v169_v26  ;;  %v276_v30 = vunpack.c.h.b16 %v169_v26  ;;  %v938_v32 = vld [vmem:[%s1349_s1] sm:$0xff]  ;;  %v985_v35 = vld [vmem:[%s1349_s1 + $0x178] sm:$0xff]  ;;  %p1051_p3 = pnand %p1050_p2, %p1046_p13 }
  0x1d   : > { %596 = vmatpush.bf16.msra.mxu1 %v951_v9  ;;  %v955_v27 = vld [vmem:[%s1349_s1 + $0x88] sm:$0xff]  ;;  %v946_v33 = vld [vmem:[%s1349_s1 + $0x40] sm:$0xff]  ;;  %v976_v42 = vld [vmem:[%s1349_s1 + $0x130] sm:$0xff] }
  0x1e   : > { %609 = vmatpush.bf16.msra.mxu2 %v959_v10  ;;  %v963_v28 = vld [vmem:[%s1349_s1 + $0xc8] sm:$0xff]  ;;  %v954_v36 = vld [vmem:[%s1349_s1 + $0x80] sm:$0xff]  ;;  %v281_v40 = vpack.c.b16 %v275_v29, %v275_v29  ;;  %v282_v41 = vpack.c.b16 %v276_v30, %v276_v30  ;;  %v984_v43 = vld [vmem:[%s1349_s1 + $0x170] sm:$0xff] }
  0x1f   : > { %622 = vmatpush.bf16.msra.mxu3 %v967_v11  ;;  %v170_v31 = vld [vmem:[%s1230_s9 + $0x8] sm:$0xff]  ;;  %v962_v37 = vld [vmem:[%s1349_s1 + $0xc0] sm:$0xff]  ;;  %v973_v50 = vld [vmem:[%s1349_s1 + $0x118] sm:$0xff] }
  0x20   : > { %584 = vmatpush.bf16.msra.mxu0 %v942_v12  ;;  %v277_v38 = vunpack.c.l.b16 %v170_v31  ;;  %v278_v39 = vunpack.c.h.b16 %v170_v31  ;;  %v975_v46 = vld [vmem:[%s1349_s1 + $0x128] sm:$0xff]  ;;  %v974_v48 = vld [vmem:[%s1349_s1 + $0x120] sm:$0xff]  ;;  %v981_v51 = vld [vmem:[%s1349_s1 + $0x158] sm:$0xff] }
  0x21   : > { %597 = vmatpush.bf16.msra.mxu1 %v950_v13  ;;  %v983_v47 = vld [vmem:[%s1349_s1 + $0x168] sm:$0xff]  ;;  %v982_v49 = vld [vmem:[%s1349_s1 + $0x160] sm:$0xff]  ;;  %v972_v52 = vld [vmem:[%s1349_s1 + $0x110] sm:$0xff] }
  0x22   : > { %610 = vmatpush.bf16.msra.mxu2 %v958_v14  ;;  %v283_v44 = vpack.c.b16 %v277_v38, %v277_v38  ;;  %v284_v45 = vpack.c.b16 %v278_v39, %v278_v39  ;;  %v980_v53 = vld [vmem:[%s1349_s1 + $0x150] sm:$0xff]  ;;  %v971_v54 = vld [vmem:[%s1349_s1 + $0x108] sm:$0xff]  ;;  %v970_v59 = vld [vmem:[%s1349_s1 + $0x100] sm:$0xff] }
  0x23   : > { %623 = vmatpush.bf16.msra.mxu3 %v966_v15  ;;  %v979_v55 = vld [vmem:[%s1349_s1 + $0x148] sm:$0xff]  ;;  %v171_v56 = vld [vmem:[%s1230_s9 + $0x10] sm:$0xff]  ;;  %v978_v60 = vld [vmem:[%s1349_s1 + $0x140] sm:$0xff] }
  0x24   : > { %585 = vmatpush.bf16.msra.mxu0 %v941_v16  ;;  %v279_v57 = vunpack.c.l.b16 %v171_v56  ;;  %v280_v58 = vunpack.c.h.b16 %v171_v56  ;;  %v1026_v5 = vld [vmem:[%s1350_s2] ss:$0 sm:$0xff] }
  0x25   : > { %598 = vmatpush.bf16.msra.mxu1 %v949_v17 }
  0x26   : > { %611 = vmatpush.bf16.msra.mxu2 %v957_v18  ;;  %v285_v61 = vpack.c.b16 %v279_v57, %v279_v57  ;;  %v286_v62 = vpack.c.b16 %v280_v58, %v280_v58 }
  0x27   : > { %624 = vmatpush.bf16.msra.mxu3 %v965_v19 }
  0x28   : > { %586 = vmatpush.bf16.msra.mxu0 %v940_v20 }
  0x29   : > { %599 = vmatpush.bf16.msra.mxu1 %v948_v21 }
  0x2a   : > { %612 = vmatpush.bf16.msra.mxu2 %v956_v22 }
  0x2b   : > { %625 = vmatpush.bf16.msra.mxu3 %v964_v23 }
  0x2c   : > { %587 = vmatpush.bf16.msra.mxu0 %v939_v24 }
  0x2d   : > { %600 = vmatpush.bf16.msra.mxu1 %v947_v25 }
  0x2e   : > { %613 = vmatpush.bf16.msra.mxu2 %v955_v27 }
  0x2f   : > { %626 = vmatpush.bf16.msra.mxu3 %v963_v28 }
  0x30   : > { %588 = vmatpush.bf16.msra.mxu0 %v938_v32 }
  0x31   : > { %601 = vmatpush.bf16.msra.mxu1 %v946_v33 }
  0x32   : > { %614 = vmatpush.bf16.msra.mxu2 %v954_v36 }
  0x33   : > { %627 = vmatpush.bf16.msra.mxu3 %v962_v37  ;;  %589 = vmatmul.bf16.vlgmr.msra.gmra.mxu0 %v281_v40 }
  0x34   : > { %633 = vmatpush.bf16.msrb.mxu0 %v977_v34  ;;  %602 = vmatmul.bf16.vlgmr.msra.gmra.mxu1 %v282_v41 }
  0x35   : > { %646 = vmatpush.bf16.msrb.mxu1 %v985_v35  ;;  %615 = vmatmul.bf16.vlgmr.msra.gmra.mxu2 %v283_v44 }
  0x36   : > { %628 = vmatmul.bf16.vlgmr.msra.gmra.mxu3 %v284_v45 }
  0x38   : > { %634 = vmatpush.bf16.msrb.mxu0 %v976_v42 }
  0x39   : > { %647 = vmatpush.bf16.msrb.mxu1 %v984_v43 }
  0x3c   : > { %635 = vmatpush.bf16.msrb.mxu0 %v975_v46 }
  0x3d   : > { %648 = vmatpush.bf16.msrb.mxu1 %v983_v47 }
  0x40   : > { %636 = vmatpush.bf16.msrb.mxu0 %v974_v48 }
  0x41   : > { %649 = vmatpush.bf16.msrb.mxu1 %v982_v49 }
  0x44   : > { %637 = vmatpush.bf16.msrb.mxu0 %v973_v50 }
  0x45   : > { %650 = vmatpush.bf16.msrb.mxu1 %v981_v51 }
  0x48   : > { %638 = vmatpush.bf16.msrb.mxu0 %v972_v52 }
  0x49   : > { %651 = vmatpush.bf16.msrb.mxu1 %v980_v53 }
  0x4c   : > { %639 = vmatpush.bf16.msrb.mxu0 %v971_v54 }
  0x4d   : > { %652 = vmatpush.bf16.msrb.mxu1 %v979_v55 }
  0x50   : > { %640 = vmatpush.bf16.msrb.mxu0 %v970_v59 }
  0x51   : > { %653 = vmatpush.bf16.msrb.mxu1 %v978_v60 }
  0x53   : > { %641 = vmatmul.bf16.vlgmr.msrb.gmra.mxu0 %v285_v61 }
  0x54   : > { %654 = vmatmul.bf16.vlgmr.msrb.gmra.mxu1 %v286_v62 }
  0xb0   : > { %v590_v63 = vpop.f32.mrf.mxu0 }
  0xb1   : > { %v603_v0 = vpop.f32.mrf.mxu1  ;;  %v591_v6 = vadd.f32 %v1026_v5, %v590_v63 }
  0xb3   : > { %v604_v9 = vadd.f32 %v603_v0, %v591_v6 }
  0xb8   : > { %v592_v1 = vpop.f32.mrf.mxu0  ;;  %v616_v3 = vpop.f32.mrf.mxu2 }
  0xb9   : > { %v605_v2 = vpop.f32.mrf.mxu1  ;;  %v629_v4 = vpop.f32.mrf.mxu3  ;;  %v617_v10 = vadd.f32 %v616_v3, %v604_v9 }
  0xbb   : > { %v630_v11 = vadd.f32 %v629_v4, %v617_v10 }
  0xc0   : > { %v618_v7 = vpop.f32.mrf.mxu2 }
  0xc1   : > { %v631_v8 = vpop.f32.mrf.mxu3 }
  0xd0   : > { %v642_v12 = vpop.f32.mrf.mxu0 }
  0xd1   : > { %v655_v13 = vpop.f32.mrf.mxu1  ;;  %v643_v14 = vadd.f32 %v642_v12, %v630_v11 }
  0xd3   : > { %v656_v15 = vadd.f32 %v655_v13, %v643_v14 }
  0xd5   : > { %v659_v16 = vpack.c.bf16 %v656_v15, %v656_v15 }
  0xd7   : > { %660 = vst [vmem:[%s163_s27] sm:$0xf] %v659_v16 }
  0xd8   : > { %v644_v17 = vpop.f32.mrf.mxu0 }
  0xd9   : > { %v657_v18 = vpop.f32.mrf.mxu1 }
  0xda   : > { %1054 = shalt.err (!%p1051_p3)
}
  0xdb   : > { %987 = dma.vmem_to_hbm [thread:$0]  (%p1149_p5), %s675_s28, 64, %s677_s29, %s662_s16  }
  0xdc PF: > { %p993_p4 = scmp.ge.s32.totalorder %s1089_s15, 2  ;;  %s688_s9 = sand.u32 1, %s1077_s12  }
  0xdd   : > { %s689_s11 = scalar_lea.sflag [#allocation3], %s688_s9 }
  0xde   : > { %p990_p7 = pnand %p993_p4, %p1153_p6 }
  0xe0   : > { %p991_p8 = pneg %p990_p7 }
  0xe2   : > { %1072 = dma.done.wait (%p991_p8), %s689_s11, 64  }
  0xe3   : > { %1074 = vsyncadd (%p991_p8), %s689_s11, 4294967232  ;;  %p13_p9 = scmp.ge.s32.totalorder %s1136_s18, 4   ;;  %s1354_s12 = smov %s1081_s13 }
  0xe4   : > { %s1355_s13 = smov %s1085_s14  ;;  %s1356_s14 = smov %s1147_s21 }
  0xe5   : > { %s1357_s15 = smov %s1136_s18  ;;  %15 = sbr.rel (!%p13_p9) target bundleno = 3 (0x3), region = 67 }
  0xea   :  { %695 = vsyncpa [#allocation3], 1 }
  0xeb   :  { %697 = vsyncpa [#allocation3 + $0x1], 1 }

// kernel: _patch_embed_impl.1
= control target key start
LH: loop header
LB: loop body
LE: loop exit
PB: predicated region body
PF: predicated region fallthrough
CT: control target
= control target key end

     0   :  { %8 = vsyncpa [#allocation3], 0  ;;  %s1348_s0 = inlined_call_operand.vmem [shape: bf16[16,768], index: 0, kind: input, shape index: {}]   ;;  %s1349_s1 = inlined_call_operand.vmem [shape: bf16[768,128], index: 1, kind: input, shape index: {}]   ;;  %s1350_s2 = inlined_call_operand.vmem [shape: f32[1,128], index: 2, kind: input, shape index: {}]   ;;  %s1351_s3 = inlined_call_operand.hbm [shape: bf16[16,128], index: 3, kind: output, shape index: {}]  }
   0x1   :  { %10 = vsyncpa [#allocation3 + $0x1], 0  ;;  %s1111_s12 = smov 0   ;;  %s1113_s13 = smov 0  }
   0x2   :  { %s1115_s14 = smov 0   ;;  %s1117_s15 = smov 0  }
   0x3 LB: > { %s1132_s16 = sadd.s32 4294967295, %s1089_s15   ;;  %s736_s17 = sadd.s32 4294967294, %s1089_s15   ;;  %s1089_s15 = sphi %s1117_s15, %s1357_s15   ;;  %s1085_s14 = sphi %s1115_s14, %s1356_s14   ;;  %s1081_s13 = sphi %s1113_s13, %s1355_s13   ;;  %s1077_s12 = sphi %s1111_s12, %s1354_s12  }
   0x4   : > { %s1136_s18 = sadd.s32 1, %s1089_s15   ;;  %s91_s19 = sadd.s32 1, %s1085_s14 }
   0x5   : > { %s88_s20 = ssub.s32 %s1089_s15, %s1136_s18  ;;  %p101_p0 = scmp.ne.s32.totalorder %s1085_s14, %s1081_s13 }
   0x6   : > { %p89_p1 = scmp.eq.s32.totalorder %s88_s20, 0  ;;  %p102_p2 = scmp.eq.s32.totalorder %s1132_s16, 1 }
   0x7   : > { %p107_p3 = scmp.ne.s32.totalorder %s1081_s13, %s1077_s12  ;;  %p108_p4 = scmp.eq.s32.totalorder %s736_s17, 1 }
   0x8   : > { %s1147_s21 = scalar_select %p89_p1, %s1085_s14, %s91_s19  }
   0x9   : > { %p1149_p5 = por %p102_p2, %p101_p0  ;;  %p1153_p6 = por %p108_p4, %p107_p3 }
   0xa   : > { %p739_p7 = scmp.ge.s32.totalorder %s1089_s15, 1  ;;  %p140_p8 = scmp.lt.s32.totalorder %s1089_s15, 3 }
   0xc   : > { %p141_p9 = pnand %p739_p7, %p140_p8 }
   0xd   : > { %p164_p10 = scmp.lt.s32.totalorder (!%p141_p9), %s1132_s16, 1  ;;  %s161_s17 = sand.u32 (!%p141_p9), 1, %s1081_s13  }
   0xe   : > { %144 = sbr.rel (%p141_p9) target bundleno = 220 (0xdc), region = 32  ;;  %s740_s19 = sshll.u32 (!%p141_p9), %s161_s17, 2 }
   0xf   : > { %s935_s20 = sshll.u32 (!%p141_p9), %s1132_s16, 2  ;;  %s163_s27 = scalar_lea.vmem (!%p141_p9), [#allocation2], %s740_s19 }
  0x10   : > { %s672_s26 = scalar_lea.hbm (!%p141_p9), %s1351_s3, %s935_s20  ;;  %s674_s28 = sshll.u32 (!%p141_p9), %s163_s27, 4  ;;  %s675_s28 = int_to_ptr.vmem [resolvable:$true] %s674_s28 }
  0x11   : > { %s676_s29 = sshll.u32 (!%p141_p9), %s672_s26, 4  ;;  %s677_s29 = int_to_ptr.hbm [resolvable:$true] %s676_s29 }
  0x12   : > { %s1041_s30 = sshra.s32 (!%p141_p9), %s677_s29, 4  ;;  %s1042_s30 = int_to_ptr.hbm [resolvable:$true] %s1041_s30 }
  0x13   : > { %v945_v0 = vld [vmem:[%s1349_s1 + $0x38] sm:$0xff]  ;;  %v944_v2 = vld [vmem:[%s1349_s1 + $0x30] sm:$0xff]  ;;  %v943_v8 = vld [vmem:[%s1349_s1 + $0x28] sm:$0xff]  ;;  %s165_s7 = scalar_select %p164_p10, %s1132_s16, 1 }
  0x14   : > { %v953_v1 = vld [vmem:[%s1349_s1 + $0x78] sm:$0xff]  ;;  %581 = vmatpush.bf16.msra.mxu0 %v945_v0  ;;  %v952_v3 = vld [vmem:[%s1349_s1 + $0x70] sm:$0xff]  ;;  %v951_v9 = vld [vmem:[%s1349_s1 + $0x68] sm:$0xff]  ;;  %s662_s16 = scalar_lea.sflag [#allocation3], %s161_s17  ;;  %s1043_s4 = scalar_lea.hbm %s1042_s30, 4 }
  0x15   : > { %594 = vmatpush.bf16.msra.mxu1 %v953_v1  ;;  %v961_v4 = vld [vmem:[%s1349_s1 + $0xb8] sm:$0xff]  ;;  %v960_v6 = vld [vmem:[%s1349_s1 + $0xb0] sm:$0xff]  ;;  %v959_v10 = vld [vmem:[%s1349_s1 + $0xa8] sm:$0xff]  ;;  %s986_s25 = smul.u32 24, %s165_s7  ;;  %p1044_p11 = scmp.ne.s32.totalorder %s1042_s30, %s1043_s4 }
  0x16   : > { %v969_v5 = vld [vmem:[%s1349_s1 + $0xf8] sm:$0xff]  ;;  %607 = vmatpush.bf16.msra.mxu2 %v961_v4  ;;  %v968_v7 = vld [vmem:[%s1349_s1 + $0xf0] sm:$0xff]  ;;  %v967_v11 = vld [vmem:[%s1349_s1 + $0xe8] sm:$0xff]  ;;  %s1047_s7 = scalar_lea.hbm %s1351_s3, 8  ;;  %p1048_p0 = scmp.lt.s32.totalorder %s1042_s30, %s1351_s3 }
  0x17   : > { %620 = vmatpush.bf16.msra.mxu3 %v969_v5  ;;  %v942_v12 = vld [vmem:[%s1349_s1 + $0x20] sm:$0xff]  ;;  %v941_v16 = vld [vmem:[%s1349_s1 + $0x18] sm:$0xff]  ;;  %v940_v20 = vld [vmem:[%s1349_s1 + $0x10] sm:$0xff]  ;;  %s1230_s9 = scalar_lea.vmem %s1348_s0, %s986_s25  ;;  %p1045_p12 = pnand %p1044_p11, %p1149_p5 }
  0x18   : > { %582 = vmatpush.bf16.msra.mxu0 %v944_v2  ;;  %v950_v13 = vld [vmem:[%s1349_s1 + $0x60] sm:$0xff]  ;;  %v949_v17 = vld [vmem:[%s1349_s1 + $0x58] sm:$0xff]  ;;  %v948_v21 = vld [vmem:[%s1349_s1 + $0x50] sm:$0xff]  ;;  %p1049_p1 = scmp.lt.s32.totalorder %s1047_s7, %s1043_s4 }
  0x19   : > { %595 = vmatpush.bf16.msra.mxu1 %v952_v3  ;;  %v958_v14 = vld [vmem:[%s1349_s1 + $0xa0] sm:$0xff]  ;;  %v957_v18 = vld [vmem:[%s1349_s1 + $0x98] sm:$0xff]  ;;  %v956_v22 = vld [vmem:[%s1349_s1 + $0x90] sm:$0xff]  ;;  %p1046_p13 = pneg %p1045_p12 }
  0x1a   : > { %608 = vmatpush.bf16.msra.mxu2 %v960_v6  ;;  %v966_v15 = vld [vmem:[%s1349_s1 + $0xe0] sm:$0xff]  ;;  %v965_v19 = vld [vmem:[%s1349_s1 + $0xd8] sm:$0xff]  ;;  %v964_v23 = vld [vmem:[%s1349_s1 + $0xd0] sm:$0xff]  ;;  %p1050_p2 = por %p1049_p1, %p1048_p0 }
  0x1b   : > { %621 = vmatpush.bf16.msra.mxu3 %v968_v7  ;;  %v939_v24 = vld [vmem:[%s1349_s1 + $0x8] sm:$0xff]  ;;  %v169_v26 = vld [vmem:[%s1230_s9] sm:$0xff]  ;;  %v977_v34 = vld [vmem:[%s1349_s1 + $0x138] sm:$0xff] }
  0x1c   : > { %583 = vmatpush.bf16.msra.mxu0 %v943_v8  ;;  %v947_v25 = vld [vmem:[%s1349_s1 + $0x48] sm:$0xff]  ;;  %v275_v29 = vunpack.c.l.b16 %v169_v26  ;;  %v276_v30 = vunpack.c.h.b16 %v169_v26  ;;  %v938_v32 = vld [vmem:[%s1349_s1] sm:$0xff]  ;;  %v985_v35 = vld [vmem:[%s1349_s1 + $0x178] sm:$0xff]  ;;  %p1051_p3 = pnand %p1050_p2, %p1046_p13 }
  0x1d   : > { %596 = vmatpush.bf16.msra.mxu1 %v951_v9  ;;  %v955_v27 = vld [vmem:[%s1349_s1 + $0x88] sm:$0xff]  ;;  %v946_v33 = vld [vmem:[%s1349_s1 + $0x40] sm:$0xff]  ;;  %v976_v42 = vld [vmem:[%s1349_s1 + $0x130] sm:$0xff] }
  0x1e   : > { %609 = vmatpush.bf16.msra.mxu2 %v959_v10  ;;  %v963_v28 = vld [vmem:[%s1349_s1 + $0xc8] sm:$0xff]  ;;  %v954_v36 = vld [vmem:[%s1349_s1 + $0x80] sm:$0xff]  ;;  %v281_v40 = vpack.c.b16 %v275_v29, %v275_v29  ;;  %v282_v41 = vpack.c.b16 %v276_v30, %v276_v30  ;;  %v984_v43 = vld [vmem:[%s1349_s1 + $0x170] sm:$0xff] }
  0x1f   : > { %622 = vmatpush.bf16.msra.mxu3 %v967_v11  ;;  %v170_v31 = vld [vmem:[%s1230_s9 + $0x8] sm:$0xff]  ;;  %v962_v37 = vld [vmem:[%s1349_s1 + $0xc0] sm:$0xff]  ;;  %v973_v50 = vld [vmem:[%s1349_s1 + $0x118] sm:$0xff] }
  0x20   : > { %584 = vmatpush.bf16.msra.mxu0 %v942_v12  ;;  %v277_v38 = vunpack.c.l.b16 %v170_v31  ;;  %v278_v39 = vunpack.c.h.b16 %v170_v31  ;;  %v975_v46 = vld [vmem:[%s1349_s1 + $0x128] sm:$0xff]  ;;  %v974_v48 = vld [vmem:[%s1349_s1 + $0x120] sm:$0xff]  ;;  %v981_v51 = vld [vmem:[%s1349_s1 + $0x158] sm:$0xff] }
  0x21   : > { %597 = vmatpush.bf16.msra.mxu1 %v950_v13  ;;  %v983_v47 = vld [vmem:[%s1349_s1 + $0x168] sm:$0xff]  ;;  %v982_v49 = vld [vmem:[%s1349_s1 + $0x160] sm:$0xff]  ;;  %v972_v52 = vld [vmem:[%s1349_s1 + $0x110] sm:$0xff] }
  0x22   : > { %610 = vmatpush.bf16.msra.mxu2 %v958_v14  ;;  %v283_v44 = vpack.c.b16 %v277_v38, %v277_v38  ;;  %v284_v45 = vpack.c.b16 %v278_v39, %v278_v39  ;;  %v980_v53 = vld [vmem:[%s1349_s1 + $0x150] sm:$0xff]  ;;  %v971_v54 = vld [vmem:[%s1349_s1 + $0x108] sm:$0xff]  ;;  %v970_v59 = vld [vmem:[%s1349_s1 + $0x100] sm:$0xff] }
  0x23   : > { %623 = vmatpush.bf16.msra.mxu3 %v966_v15  ;;  %v979_v55 = vld [vmem:[%s1349_s1 + $0x148] sm:$0xff]  ;;  %v171_v56 = vld [vmem:[%s1230_s9 + $0x10] sm:$0xff]  ;;  %v978_v60 = vld [vmem:[%s1349_s1 + $0x140] sm:$0xff] }
  0x24   : > { %585 = vmatpush.bf16.msra.mxu0 %v941_v16  ;;  %v279_v57 = vunpack.c.l.b16 %v171_v56  ;;  %v280_v58 = vunpack.c.h.b16 %v171_v56  ;;  %v1026_v5 = vld [vmem:[%s1350_s2] ss:$0 sm:$0xff] }
  0x25   : > { %598 = vmatpush.bf16.msra.mxu1 %v949_v17 }
  0x26   : > { %611 = vmatpush.bf16.msra.mxu2 %v957_v18  ;;  %v285_v61 = vpack.c.b16 %v279_v57, %v279_v57  ;;  %v286_v62 = vpack.c.b16 %v280_v58, %v280_v58 }
  0x27   : > { %624 = vmatpush.bf16.msra.mxu3 %v965_v19 }
  0x28   : > { %586 = vmatpush.bf16.msra.mxu0 %v940_v20 }
  0x29   : > { %599 = vmatpush.bf16.msra.mxu1 %v948_v21 }
  0x2a   : > { %612 = vmatpush.bf16.msra.mxu2 %v956_v22 }
  0x2b   : > { %625 = vmatpush.bf16.msra.mxu3 %v964_v23 }
  0x2c   : > { %587 = vmatpush.bf16.msra.mxu0 %v939_v24 }
  0x2d   : > { %600 = vmatpush.bf16.msra.mxu1 %v947_v25 }
  0x2e   : > { %613 = vmatpush.bf16.msra.mxu2 %v955_v27 }
  0x2f   : > { %626 = vmatpush.bf16.msra.mxu3 %v963_v28 }
  0x30   : > { %588 = vmatpush.bf16.msra.mxu0 %v938_v32 }
  0x31   : > { %601 = vmatpush.bf16.msra.mxu1 %v946_v33 }
  0x32   : > { %614 = vmatpush.bf16.msra.mxu2 %v954_v36 }
  0x33   : > { %627 = vmatpush.bf16.msra.mxu3 %v962_v37  ;;  %589 = vmatmul.bf16.vlgmr.msra.gmra.mxu0 %v281_v40 }
  0x34   : > { %633 = vmatpush.bf16.msrb.mxu0 %v977_v34  ;;  %602 = vmatmul.bf16.vlgmr.msra.gmra.mxu1 %v282_v41 }
  0x35   : > { %646 = vmatpush.bf16.msrb.mxu1 %v985_v35  ;;  %615 = vmatmul.bf16.vlgmr.msra.gmra.mxu2 %v283_v44 }
  0x36   : > { %628 = vmatmul.bf16.vlgmr.msra.gmra.mxu3 %v284_v45 }
  0x38   : > { %634 = vmatpush.bf16.msrb.mxu0 %v976_v42 }
  0x39   : > { %647 = vmatpush.bf16.msrb.mxu1 %v984_v43 }
  0x3c   : > { %635 = vmatpush.bf16.msrb.mxu0 %v975_v46 }
  0x3d   : > { %648 = vmatpush.bf16.msrb.mxu1 %v983_v47 }
  0x40   : > { %636 = vmatpush.bf16.msrb.mxu0 %v974_v48 }
  0x41   : > { %649 = vmatpush.bf16.msrb.mxu1 %v982_v49 }
  0x44   : > { %637 = vmatpush.bf16.msrb.mxu0 %v973_v50 }
  0x45   : > { %650 = vmatpush.bf16.msrb.mxu1 %v981_v51 }
  0x48   : > { %638 = vmatpush.bf16.msrb.mxu0 %v972_v52 }
  0x49   : > { %651 = vmatpush.bf16.msrb.mxu1 %v980_v53 }
  0x4c   : > { %639 = vmatpush.bf16.msrb.mxu0 %v971_v54 }
  0x4d   : > { %652 = vmatpush.bf16.msrb.mxu1 %v979_v55 }
  0x50   : > { %640 = vmatpush.bf16.msrb.mxu0 %v970_v59 }
  0x51   : > { %653 = vmatpush.bf16.msrb.mxu1 %v978_v60 }
  0x53   : > { %641 = vmatmul.bf16.vlgmr.msrb.gmra.mxu0 %v285_v61 }
  0x54   : > { %654 = vmatmul.bf16.vlgmr.msrb.gmra.mxu1 %v286_v62 }
  0xb0   : > { %v590_v63 = vpop.f32.mrf.mxu0 }
  0xb1   : > { %v603_v0 = vpop.f32.mrf.mxu1  ;;  %v591_v6 = vadd.f32 %v1026_v5, %v590_v63 }
  0xb3   : > { %v604_v9 = vadd.f32 %v603_v0, %v591_v6 }
  0xb8   : > { %v592_v1 = vpop.f32.mrf.mxu0  ;;  %v616_v3 = vpop.f32.mrf.mxu2 }
  0xb9   : > { %v605_v2 = vpop.f32.mrf.mxu1  ;;  %v629_v4 = vpop.f32.mrf.mxu3  ;;  %v617_v10 = vadd.f32 %v616_v3, %v604_v9 }
  0xbb   : > { %v630_v11 = vadd.f32 %v629_v4, %v617_v10 }
  0xc0   : > { %v618_v7 = vpop.f32.mrf.mxu2 }
  0xc1   : > { %v631_v8 = vpop.f32.mrf.mxu3 }
  0xd0   : > { %v642_v12 = vpop.f32.mrf.mxu0 }
  0xd1   : > { %v655_v13 = vpop.f32.mrf.mxu1  ;;  %v643_v14 = vadd.f32 %v642_v12, %v630_v11 }
  0xd3   : > { %v656_v15 = vadd.f32 %v655_v13, %v643_v14 }
  0xd5   : > { %v659_v16 = vpack.c.bf16 %v656_v15, %v656_v15 }
  0xd7   : > { %660 = vst [vmem:[%s163_s27] sm:$0xf] %v659_v16 }
  0xd8   : > { %v644_v17 = vpop.f32.mrf.mxu0 }
  0xd9   : > { %v657_v18 = vpop.f32.mrf.mxu1 }
  0xda   : > { %1054 = shalt.err (!%p1051_p3)
}
  0xdb   : > { %987 = dma.vmem_to_hbm [thread:$0]  (%p1149_p5), %s675_s28, 64, %s677_s29, %s662_s16  }
  0xdc PF: > { %p993_p4 = scmp.ge.s32.totalorder %s1089_s15, 2  ;;  %s688_s9 = sand.u32 1, %s1077_s12  }
  0xdd   : > { %s689_s11 = scalar_lea.sflag [#allocation3], %s688_s9 }
  0xde   : > { %p990_p7 = pnand %p993_p4, %p1153_p6 }
  0xe0   : > { %p991_p8 = pneg %p990_p7 }
  0xe2   : > { %1072 = dma.done.wait (%p991_p8), %s689_s11, 64  }
  0xe3   : > { %1074 = vsyncadd (%p991_p8), %s689_s11, 4294967232  ;;  %p13_p9 = scmp.ge.s32.totalorder %s1136_s18, 4   ;;  %s1354_s12 = smov %s1081_s13 }
  0xe4   : > { %s1355_s13 = smov %s1085_s14  ;;  %s1356_s14 = smov %s1147_s21 }
  0xe5   : > { %s1357_s15 = smov %s1136_s18  ;;  %15 = sbr.rel (!%p13_p9) target bundleno = 3 (0x3), region = 67 }
  0xea   :  { %695 = vsyncpa [#allocation3], 1 }
  0xeb   :  { %697 = vsyncpa [#allocation3 + $0x1], 1 }

</bundles_post_ra>
